<compile_context>
chip_gen: v6e
topology: v6e:2x2x1
jax: 0.10.0
libtpu: 0.0.40
codegen_flags: <defaults>
</compile_context>

<pallas_src>
import functools

import jax
import jax.numpy as jnp
from jax.experimental import pallas as pl
from jax.experimental.pallas import tpu as pltpu


def _attention_kernel(x_ref, wqkv_ref, bqkv_ref, wp_ref, bp_ref, o_ref, wa_ref,
                      *, n_heads, head_dim, b_tile, n_tokens, dim):
    M = b_tile * n_tokens
    x = x_ref[...].reshape(M, dim)                                   # (M, D)

    # Fused QKV projection (one MXU pass over x, one weight push).  The softmax
    # scale is pre-folded into the Q columns by the wrapper, so the score tiles
    # below never need rescaling.
    qkv = jnp.dot(x, wqkv_ref[...],
                  preferred_element_type=jnp.float32) + bqkv_ref[...]  # (M, 3D)

    # Per-head attention, batched over the samples of this tile.  3-D einsums
    # with a single batch dim lower to batched MXU matmuls.
    for h in range(n_heads):
        lo = h * head_dim
        hi = lo + head_dim
        qh = qkv[:, lo:hi].reshape(b_tile, n_tokens, head_dim)
        kh = qkv[:, dim + lo:dim + hi].reshape(b_tile, n_tokens, head_dim)
        vh = qkv[:, 2 * dim + lo:2 * dim + hi].reshape(b_tile, n_tokens, head_dim)

        # scores (already scaled): (b, q, k)
        s = jnp.einsum("bqd,bkd->bqk", qh, kh,
                       preferred_element_type=jnp.float32)
        s = s - jnp.max(s, axis=-1, keepdims=True)        # XLU reduce (free slot)
        p = jnp.exp(s)                                    # EUP
        denom = jnp.sum(p, axis=-1, keepdims=True)
        inv = pl.reciprocal(denom, approx=True)           # EUP slot (near free)
        inv = inv * (2.0 - denom * inv)                   # one Newton step -> ~f32
        p = p * inv

        wa_h = jnp.einsum("bqk,bkd->bqd", p, vh,
                          preferred_element_type=jnp.float32)        # (b, n, hd)
        wa_ref[:, lo:hi] = wa_h.reshape(M, head_dim)

    # Output projection: ONE (M, D) @ (D, D) matmul over the concatenated heads.
    out = jnp.dot(wa_ref[...], wp_ref[...],
                  preferred_element_type=jnp.float32) + bp_ref[...]
    o_ref[...] = out.reshape(b_tile, n_tokens, dim).astype(o_ref.dtype)


def _pick_b_tile(batch, n_tokens, dim, in_bytes=4,
                 target_rows=256, vmem_budget=24 * 1024 * 1024):
    """Largest divisor of `batch` giving ~target_rows MXU rows within VMEM."""
    cap_rows = max(1, target_rows // max(n_tokens, 1))
    best = 1
    for d in range(1, batch + 1):
        if batch % d != 0 or d > cap_rows:
            continue
        m = d * n_tokens
        est = (2 * 2 * m * dim * in_bytes                       # x + out, 2-buffered
               + 2 * 4 * (dim * 3 * dim + 3 * dim + dim * dim + dim)  # weights, 2-buf
               + 4 * m * dim                                    # wa scratch (f32)
               + 4 * m * 3 * dim                                # qkv intermediate
               + 4 * 2 * d * n_tokens * n_tokens)               # scores + probs
        if est <= vmem_budget:
            best = d
    return best


def attention_forward(x, w_qkv, b_qkv, w_proj, b_proj, *, n_heads):
    """x: (B, N, D); w_qkv: (3D, D); b_qkv: (3D,); w_proj: (D, D); b_proj: (D,)."""
    B, N, D = x.shape
    assert D % n_heads == 0
    head_dim = D // n_heads
    scale = head_dim ** (-0.5)
    f32 = jnp.float32

    # nn.Linear computes y = x @ W.T + b, so transpose once here (glue; in a
    # real model this is hoisted to parameter-load time).  Fold the softmax
    # scale into the Q columns of the fused weight/bias.
    col_scale = jnp.concatenate(
        [jnp.full((D,), scale, f32), jnp.ones((2 * D,), f32)])
    w_fused = jnp.asarray(w_qkv, f32).T * col_scale[None, :]        # (D, 3D)
    b_fused = (jnp.asarray(b_qkv, f32) * col_scale).reshape(1, 3 * D)
    wp = jnp.asarray(w_proj, f32).T                                 # (D, D)
    bp = jnp.asarray(b_proj, f32).reshape(1, D)

    b_tile = _pick_b_tile(B, N, D, in_bytes=jnp.dtype(x.dtype).itemsize)
    grid = (B // b_tile,)
    # NOTE: for v7x (2 TensorCores) a grid with >= 2 "parallel" steps lets the
    # megacore split work; for bigger models also consider bf16 operands for
    # the p@v / projection matmuls on v6e/v7x.

    kernel = functools.partial(
        _attention_kernel, n_heads=n_heads, head_dim=head_dim,
        b_tile=b_tile, n_tokens=N, dim=D)

    return pl.pallas_call(
        kernel,
        out_shape=jax.ShapeDtypeStruct((B, N, D), x.dtype),
        grid_spec=pltpu.PrefetchScalarGridSpec(
            num_scalar_prefetch=0,
            grid=grid,
            in_specs=[
                pl.BlockSpec((b_tile, N, D), lambda b: (b, 0, 0)),   # x tile
                pl.BlockSpec((D, 3 * D), lambda b: (0, 0)),          # fused W_qkv
                pl.BlockSpec((1, 3 * D), lambda b: (0, 0)),          # fused b_qkv
                pl.BlockSpec((D, D), lambda b: (0, 0)),              # W_proj
                pl.BlockSpec((1, D), lambda b: (0, 0)),              # b_proj
            ],
            out_specs=pl.BlockSpec((b_tile, N, D), lambda b: (b, 0, 0)),
            scratch_shapes=[pltpu.VMEM((b_tile * N, D), jnp.float32)],
        ),
        compiler_params=pltpu.CompilerParams(
            dimension_semantics=("parallel",)),
    )(x, w_fused, b_fused, wp, bp)


def attention_reference(x, w_qkv, b_qkv, w_proj, b_proj, *, n_heads):
    """Pure-JAX reference mirroring the PyTorch forward exactly."""
    B, N, D = x.shape
    head_dim = D // n_heads
    scale = head_dim ** (-0.5)
    qkv = x @ w_qkv.T + b_qkv                               # (B, N, 3D)
    qkv = qkv.reshape(B, N, 3, n_heads, head_dim)
    qkv = jnp.transpose(qkv, (2, 0, 3, 1, 4))               # (3, B, H, N, hd)
    q, k, v = qkv[0], qkv[1], qkv[2]
    dp = jnp.einsum("bhqd,bhkd->bhqk", q, k) * scale
    attn = jax.nn.softmax(dp, axis=-1)
    wa = jnp.einsum("bhqk,bhkd->bhqd", attn, v)             # (B, H, N, hd)
    wa = jnp.transpose(wa, (0, 2, 1, 3)).reshape(B, N, D)
    return wa @ w_proj.T + b_proj


if __name__ == "__main__":
    # Small, deterministic problem: batch=2, tokens=8, dim=64, heads=4.
    B, N, D, H = 2, 8, 64, 4

    key = jax.random.PRNGKey(0)
    kx, kw1, kb1, kw2, kb2 = jax.random.split(key, 5)

    x = jax.random.normal(kx, (B, N, D), dtype=jnp.float32)
    w_qkv = 0.02 * jax.random.normal(kw1, (3 * D, D), dtype=jnp.float32)
    b_qkv = 0.01 * jax.random.normal(kb1, (3 * D,), dtype=jnp.float32)
    w_proj = 0.02 * jax.random.normal(kw2, (D, D), dtype=jnp.float32)
    b_proj = 0.01 * jax.random.normal(kb2, (D,), dtype=jnp.float32)

    out = attention_forward(x, w_qkv, b_qkv, w_proj, b_proj, n_heads=H)
    out = jax.block_until_ready(out)

    ref = attention_reference(x, w_qkv, b_qkv, w_proj, b_proj, n_heads=H)
    assert out.shape == (B, N, D)
    err = jnp.max(jnp.abs(out - ref))
    assert jnp.allclose(out, ref, rtol=1e-4, atol=1e-4), f"max abs err = {err}"

    print("KERNEL_OK")
</pallas_src>

<mosaic_0001>
module attributes {stable_mosaic.version = 11 : i64} {
  func.func @_attention_kernel(%arg0: i32, %arg1: memref<2x8x64xf32, #tpu.memory_space<vmem>>, %arg2: memref<64x192xf32, #tpu.memory_space<vmem>>, %arg3: memref<1x192xf32, #tpu.memory_space<vmem>>, %arg4: memref<64x64xf32, #tpu.memory_space<vmem>>, %arg5: memref<1x64xf32, #tpu.memory_space<vmem>>, %arg6: memref<2x8x64xf32, #tpu.memory_space<vmem>>, %arg7: memref<16x64xf32, #tpu.memory_space<vmem>>) attributes {dimension_semantics = [#tpu.dimension_semantics<parallel>], iteration_bounds = array<i64: 1>, scalar_prefetch = 0 : i64, scratch_operands = 1 : i64, tpu.core_type = #tpu.core_type<tc>, window_params = [{transform_indices = @transform_0, window_bounds = array<i64: 2, 8, 64>}, {pipeline_mode = #tpu.pipeline_mode<synchronous>, transform_indices = @transform_1, window_bounds = array<i64: 64, 192>}, {pipeline_mode = #tpu.pipeline_mode<synchronous>, transform_indices = @transform_2, window_bounds = array<i64: 1, 192>}, {pipeline_mode = #tpu.pipeline_mode<synchronous>, transform_indices = @transform_3, window_bounds = array<i64: 64, 64>}, {pipeline_mode = #tpu.pipeline_mode<synchronous>, transform_indices = @transform_4, window_bounds = array<i64: 1, 64>}, {transform_indices = @transform_5, window_bounds = array<i64: 2, 8, 64>}]} {
    %c0 = arith.constant 0 : index
    %c0_0 = arith.constant 0 : index
    %c0_1 = arith.constant 0 : index
    %0 = vector.load %arg1[%c0, %c0_0, %c0_1] : memref<2x8x64xf32, #tpu.memory_space<vmem>>, vector<2x8x64xf32>
    %1 = vector.shape_cast %0 : vector<2x8x64xf32> to vector<16x64xf32>
    %c0_2 = arith.constant 0 : index
    %c0_3 = arith.constant 0 : index
    %2 = vector.load %arg2[%c0_2, %c0_3] : memref<64x192xf32, #tpu.memory_space<vmem>>, vector<64x192xf32>
    %cst = arith.constant dense<0.000000e+00> : vector<16x192xf32>
    %3 = tpu.matmul %1, %2, %cst {dimension_numbers = #tpu.dot_dimension_numbers<[1], [0], [0], [1], [0, 0, 1, 1], [], []>} : vector<16x64xf32>, vector<64x192xf32>, vector<16x192xf32> -> vector<16x192xf32>
    %c0_4 = arith.constant 0 : index
    %c0_5 = arith.constant 0 : index
    %4 = vector.load %arg3[%c0_4, %c0_5] : memref<1x192xf32, #tpu.memory_space<vmem>>, vector<1x192xf32>
    %5 = vector.broadcast %4 : vector<1x192xf32> to vector<16x192xf32>
    %6 = arith.addf %3, %5 : vector<16x192xf32>
    %7 = vector.extract_strided_slice %6 {offsets = [0, 0], sizes = [16, 16], strides = [1, 1]} : vector<16x192xf32> to vector<16x16xf32>
    %8 = vector.shape_cast %7 : vector<16x16xf32> to vector<2x8x16xf32>
    %9 = vector.extract_strided_slice %6 {offsets = [0, 64], sizes = [16, 16], strides = [1, 1]} : vector<16x192xf32> to vector<16x16xf32>
    %10 = vector.shape_cast %9 : vector<16x16xf32> to vector<2x8x16xf32>
    %11 = vector.extract_strided_slice %6 {offsets = [0, 128], sizes = [16, 16], strides = [1, 1]} : vector<16x192xf32> to vector<16x16xf32>
    %12 = vector.shape_cast %11 : vector<16x16xf32> to vector<2x8x16xf32>
    "tpu.trace_start"() <{level = 10 : i32, message = "bqd,bkd->bqk"}> : () -> ()
    %cst_6 = arith.constant dense<0.000000e+00> : vector<2x8x8xf32>
    %13 = tpu.matmul %8, %10, %cst_6 {dimension_numbers = #tpu.dot_dimension_numbers<[2], [2], [1], [1], [0, 0, 0, 1, 1, 1], [0], [0]>} : vector<2x8x16xf32>, vector<2x8x16xf32>, vector<2x8x8xf32> -> vector<2x8x8xf32>
    "tpu.trace_stop"() : () -> ()
    %cst_7 = arith.constant dense<0xFF800000> : vector<2x8xf32>
    %14 = vector.multi_reduction <maximumf>, %13, %cst_7 [2] : vector<2x8x8xf32> to vector<2x8xf32>
    %15 = vector.shape_cast %14 : vector<2x8xf32> to vector<2x8x1xf32>
    %16 = vector.broadcast %15 : vector<2x8x1xf32> to vector<2x8x8xf32>
    %17 = arith.subf %13, %16 : vector<2x8x8xf32>
    %18 = math.exp %17 : vector<2x8x8xf32>
    %cst_8 = arith.constant dense<0.000000e+00> : vector<2x8xf32>
    %19 = vector.multi_reduction <add>, %18, %cst_8 [2] : vector<2x8x8xf32> to vector<2x8xf32>
    %20 = vector.shape_cast %19 : vector<2x8xf32> to vector<2x8x1xf32>
    %21 = tpu.reciprocal %20 {approx = true} : vector<2x8x1xf32> -> vector<2x8x1xf32>
    %22 = arith.mulf %20, %21 : vector<2x8x1xf32>
    %cst_9 = arith.constant 2.000000e+00 : f32
    %23 = vector.broadcast %cst_9 : f32 to vector<2x8x1xf32>
    %24 = arith.subf %23, %22 : vector<2x8x1xf32>
    %25 = arith.mulf %21, %24 : vector<2x8x1xf32>
    %26 = vector.broadcast %25 : vector<2x8x1xf32> to vector<2x8x8xf32>
    %27 = arith.mulf %18, %26 : vector<2x8x8xf32>
    "tpu.trace_start"() <{level = 10 : i32, message = "bqk,bkd->bqd"}> : () -> ()
    %cst_10 = arith.constant dense<0.000000e+00> : vector<2x8x16xf32>
    %28 = tpu.matmul %27, %12, %cst_10 {dimension_numbers = #tpu.dot_dimension_numbers<[2], [1], [1], [2], [0, 0, 0, 1, 1, 2], [0], [0]>} : vector<2x8x8xf32>, vector<2x8x16xf32>, vector<2x8x16xf32> -> vector<2x8x16xf32>
    "tpu.trace_stop"() : () -> ()
    %29 = vector.shape_cast %28 : vector<2x8x16xf32> to vector<16x16xf32>
    %c0_11 = arith.constant 0 : index
    %c0_12 = arith.constant 0 : index
    %30 = vector.load %arg7[%c0_11, %c0_12] : memref<16x64xf32, #tpu.memory_space<vmem>>, vector<16x16xf32>
    tpu.vector_store %arg7[%c0_11, %c0_12], %29 {strides = array<i32>} : memref<16x64xf32, #tpu.memory_space<vmem>>, vector<16x16xf32>,
    %31 = vector.extract_strided_slice %6 {offsets = [0, 16], sizes = [16, 16], strides = [1, 1]} : vector<16x192xf32> to vector<16x16xf32>
    %32 = vector.shape_cast %31 : vector<16x16xf32> to vector<2x8x16xf32>
    %33 = vector.extract_strided_slice %6 {offsets = [0, 80], sizes = [16, 16], strides = [1, 1]} : vector<16x192xf32> to vector<16x16xf32>
    %34 = vector.shape_cast %33 : vector<16x16xf32> to vector<2x8x16xf32>
    %35 = vector.extract_strided_slice %6 {offsets = [0, 144], sizes = [16, 16], strides = [1, 1]} : vector<16x192xf32> to vector<16x16xf32>
    %36 = vector.shape_cast %35 : vector<16x16xf32> to vector<2x8x16xf32>
    "tpu.trace_start"() <{level = 10 : i32, message = "bqd,bkd->bqk"}> : () -> ()
    %cst_13 = arith.constant dense<0.000000e+00> : vector<2x8x8xf32>
    %37 = tpu.matmul %32, %34, %cst_13 {dimension_numbers = #tpu.dot_dimension_numbers<[2], [2], [1], [1], [0, 0, 0, 1, 1, 1], [0], [0]>} : vector<2x8x16xf32>, vector<2x8x16xf32>, vector<2x8x8xf32> -> vector<2x8x8xf32>
    "tpu.trace_stop"() : () -> ()
    %cst_14 = arith.constant dense<0xFF800000> : vector<2x8xf32>
    %38 = vector.multi_reduction <maximumf>, %37, %cst_14 [2] : vector<2x8x8xf32> to vector<2x8xf32>
    %39 = vector.shape_cast %38 : vector<2x8xf32> to vector<2x8x1xf32>
    %40 = vector.broadcast %39 : vector<2x8x1xf32> to vector<2x8x8xf32>
    %41 = arith.subf %37, %40 : vector<2x8x8xf32>
    %42 = math.exp %41 : vector<2x8x8xf32>
    %cst_15 = arith.constant dense<0.000000e+00> : vector<2x8xf32>
    %43 = vector.multi_reduction <add>, %42, %cst_15 [2] : vector<2x8x8xf32> to vector<2x8xf32>
    %44 = vector.shape_cast %43 : vector<2x8xf32> to vector<2x8x1xf32>
    %45 = tpu.reciprocal %44 {approx = true} : vector<2x8x1xf32> -> vector<2x8x1xf32>
    %46 = arith.mulf %44, %45 : vector<2x8x1xf32>
    %cst_16 = arith.constant 2.000000e+00 : f32
    %47 = vector.broadcast %cst_16 : f32 to vector<2x8x1xf32>
    %48 = arith.subf %47, %46 : vector<2x8x1xf32>
    %49 = arith.mulf %45, %48 : vector<2x8x1xf32>
    %50 = vector.broadcast %49 : vector<2x8x1xf32> to vector<2x8x8xf32>
    %51 = arith.mulf %42, %50 : vector<2x8x8xf32>
    "tpu.trace_start"() <{level = 10 : i32, message = "bqk,bkd->bqd"}> : () -> ()
    %cst_17 = arith.constant dense<0.000000e+00> : vector<2x8x16xf32>
    %52 = tpu.matmul %51, %36, %cst_17 {dimension_numbers = #tpu.dot_dimension_numbers<[2], [1], [1], [2], [0, 0, 0, 1, 1, 2], [0], [0]>} : vector<2x8x8xf32>, vector<2x8x16xf32>, vector<2x8x16xf32> -> vector<2x8x16xf32>
    "tpu.trace_stop"() : () -> ()
    %53 = vector.shape_cast %52 : vector<2x8x16xf32> to vector<16x16xf32>
    %c0_18 = arith.constant 0 : index
    %c16 = arith.constant 16 : index
    %54 = vector.load %arg7[%c0_18, %c16] : memref<16x64xf32, #tpu.memory_space<vmem>>, vector<16x16xf32>
    tpu.vector_store %arg7[%c0_18, %c16], %53 {strides = array<i32>} : memref<16x64xf32, #tpu.memory_space<vmem>>, vector<16x16xf32>,
    %55 = vector.extract_strided_slice %6 {offsets = [0, 32], sizes = [16, 16], strides = [1, 1]} : vector<16x192xf32> to vector<16x16xf32>
    %56 = vector.shape_cast %55 : vector<16x16xf32> to vector<2x8x16xf32>
    %57 = vector.extract_strided_slice %6 {offsets = [0, 96], sizes = [16, 16], strides = [1, 1]} : vector<16x192xf32> to vector<16x16xf32>
    %58 = vector.shape_cast %57 : vector<16x16xf32> to vector<2x8x16xf32>
    %59 = vector.extract_strided_slice %6 {offsets = [0, 160], sizes = [16, 16], strides = [1, 1]} : vector<16x192xf32> to vector<16x16xf32>
    %60 = vector.shape_cast %59 : vector<16x16xf32> to vector<2x8x16xf32>
    "tpu.trace_start"() <{level = 10 : i32, message = "bqd,bkd->bqk"}> : () -> ()
    %cst_19 = arith.constant dense<0.000000e+00> : vector<2x8x8xf32>
    %61 = tpu.matmul %56, %58, %cst_19 {dimension_numbers = #tpu.dot_dimension_numbers<[2], [2], [1], [1], [0, 0, 0, 1, 1, 1], [0], [0]>} : vector<2x8x16xf32>, vector<2x8x16xf32>, vector<2x8x8xf32> -> vector<2x8x8xf32>
    "tpu.trace_stop"() : () -> ()
    %cst_20 = arith.constant dense<0xFF800000> : vector<2x8xf32>
    %62 = vector.multi_reduction <maximumf>, %61, %cst_20 [2] : vector<2x8x8xf32> to vector<2x8xf32>
    %63 = vector.shape_cast %62 : vector<2x8xf32> to vector<2x8x1xf32>
    %64 = vector.broadcast %63 : vector<2x8x1xf32> to vector<2x8x8xf32>
    %65 = arith.subf %61, %64 : vector<2x8x8xf32>
    %66 = math.exp %65 : vector<2x8x8xf32>
    %cst_21 = arith.constant dense<0.000000e+00> : vector<2x8xf32>
    %67 = vector.multi_reduction <add>, %66, %cst_21 [2] : vector<2x8x8xf32> to vector<2x8xf32>
    %68 = vector.shape_cast %67 : vector<2x8xf32> to vector<2x8x1xf32>
    %69 = tpu.reciprocal %68 {approx = true} : vector<2x8x1xf32> -> vector<2x8x1xf32>
    %70 = arith.mulf %68, %69 : vector<2x8x1xf32>
    %cst_22 = arith.constant 2.000000e+00 : f32
    %71 = vector.broadcast %cst_22 : f32 to vector<2x8x1xf32>
    %72 = arith.subf %71, %70 : vector<2x8x1xf32>
    %73 = arith.mulf %69, %72 : vector<2x8x1xf32>
    %74 = vector.broadcast %73 : vector<2x8x1xf32> to vector<2x8x8xf32>
    %75 = arith.mulf %66, %74 : vector<2x8x8xf32>
    "tpu.trace_start"() <{level = 10 : i32, message = "bqk,bkd->bqd"}> : () -> ()
    %cst_23 = arith.constant dense<0.000000e+00> : vector<2x8x16xf32>
    %76 = tpu.matmul %75, %60, %cst_23 {dimension_numbers = #tpu.dot_dimension_numbers<[2], [1], [1], [2], [0, 0, 0, 1, 1, 2], [0], [0]>} : vector<2x8x8xf32>, vector<2x8x16xf32>, vector<2x8x16xf32> -> vector<2x8x16xf32>
    "tpu.trace_stop"() : () -> ()
    %77 = vector.shape_cast %76 : vector<2x8x16xf32> to vector<16x16xf32>
    %c0_24 = arith.constant 0 : index
    %c32 = arith.constant 32 : index
    %78 = vector.load %arg7[%c0_24, %c32] : memref<16x64xf32, #tpu.memory_space<vmem>>, vector<16x16xf32>
    tpu.vector_store %arg7[%c0_24, %c32], %77 {strides = array<i32>} : memref<16x64xf32, #tpu.memory_space<vmem>>, vector<16x16xf32>,
    %79 = vector.extract_strided_slice %6 {offsets = [0, 48], sizes = [16, 16], strides = [1, 1]} : vector<16x192xf32> to vector<16x16xf32>
    %80 = vector.shape_cast %79 : vector<16x16xf32> to vector<2x8x16xf32>
    %81 = vector.extract_strided_slice %6 {offsets = [0, 112], sizes = [16, 16], strides = [1, 1]} : vector<16x192xf32> to vector<16x16xf32>
    %82 = vector.shape_cast %81 : vector<16x16xf32> to vector<2x8x16xf32>
    %83 = vector.extract_strided_slice %6 {offsets = [0, 176], sizes = [16, 16], strides = [1, 1]} : vector<16x192xf32> to vector<16x16xf32>
    %84 = vector.shape_cast %83 : vector<16x16xf32> to vector<2x8x16xf32>
    "tpu.trace_start"() <{level = 10 : i32, message = "bqd,bkd->bqk"}> : () -> ()
    %cst_25 = arith.constant dense<0.000000e+00> : vector<2x8x8xf32>
    %85 = tpu.matmul %80, %82, %cst_25 {dimension_numbers = #tpu.dot_dimension_numbers<[2], [2], [1], [1], [0, 0, 0, 1, 1, 1], [0], [0]>} : vector<2x8x16xf32>, vector<2x8x16xf32>, vector<2x8x8xf32> -> vector<2x8x8xf32>
    "tpu.trace_stop"() : () -> ()
    %cst_26 = arith.constant dense<0xFF800000> : vector<2x8xf32>
    %86 = vector.multi_reduction <maximumf>, %85, %cst_26 [2] : vector<2x8x8xf32> to vector<2x8xf32>
    %87 = vector.shape_cast %86 : vector<2x8xf32> to vector<2x8x1xf32>
    %88 = vector.broadcast %87 : vector<2x8x1xf32> to vector<2x8x8xf32>
    %89 = arith.subf %85, %88 : vector<2x8x8xf32>
    %90 = math.exp %89 : vector<2x8x8xf32>
    %cst_27 = arith.constant dense<0.000000e+00> : vector<2x8xf32>
    %91 = vector.multi_reduction <add>, %90, %cst_27 [2] : vector<2x8x8xf32> to vector<2x8xf32>
    %92 = vector.shape_cast %91 : vector<2x8xf32> to vector<2x8x1xf32>
    %93 = tpu.reciprocal %92 {approx = true} : vector<2x8x1xf32> -> vector<2x8x1xf32>
    %94 = arith.mulf %92, %93 : vector<2x8x1xf32>
    %cst_28 = arith.constant 2.000000e+00 : f32
    %95 = vector.broadcast %cst_28 : f32 to vector<2x8x1xf32>
    %96 = arith.subf %95, %94 : vector<2x8x1xf32>
    %97 = arith.mulf %93, %96 : vector<2x8x1xf32>
    %98 = vector.broadcast %97 : vector<2x8x1xf32> to vector<2x8x8xf32>
    %99 = arith.mulf %90, %98 : vector<2x8x8xf32>
    "tpu.trace_start"() <{level = 10 : i32, message = "bqk,bkd->bqd"}> : () -> ()
    %cst_29 = arith.constant dense<0.000000e+00> : vector<2x8x16xf32>
    %100 = tpu.matmul %99, %84, %cst_29 {dimension_numbers = #tpu.dot_dimension_numbers<[2], [1], [1], [2], [0, 0, 0, 1, 1, 2], [0], [0]>} : vector<2x8x8xf32>, vector<2x8x16xf32>, vector<2x8x16xf32> -> vector<2x8x16xf32>
    "tpu.trace_stop"() : () -> ()
    %101 = vector.shape_cast %100 : vector<2x8x16xf32> to vector<16x16xf32>
    %c0_30 = arith.constant 0 : index
    %c48 = arith.constant 48 : index
    %102 = vector.load %arg7[%c0_30, %c48] : memref<16x64xf32, #tpu.memory_space<vmem>>, vector<16x16xf32>
    tpu.vector_store %arg7[%c0_30, %c48], %101 {strides = array<i32>} : memref<16x64xf32, #tpu.memory_space<vmem>>, vector<16x16xf32>,
    %c0_31 = arith.constant 0 : index
    %c0_32 = arith.constant 0 : index
    %103 = vector.load %arg7[%c0_31, %c0_32] : memref<16x64xf32, #tpu.memory_space<vmem>>, vector<16x64xf32>
    %c0_33 = arith.constant 0 : index
    %c0_34 = arith.constant 0 : index
    %104 = vector.load %arg4[%c0_33, %c0_34] : memref<64x64xf32, #tpu.memory_space<vmem>>, vector<64x64xf32>
    %cst_35 = arith.constant dense<0.000000e+00> : vector<16x64xf32>
    %105 = tpu.matmul %103, %104, %cst_35 {dimension_numbers = #tpu.dot_dimension_numbers<[1], [0], [0], [1], [0, 0, 1, 1], [], []>} : vector<16x64xf32>, vector<64x64xf32>, vector<16x64xf32> -> vector<16x64xf32>
    %c0_36 = arith.constant 0 : index
    %c0_37 = arith.constant 0 : index
    %106 = vector.load %arg5[%c0_36, %c0_37] : memref<1x64xf32, #tpu.memory_space<vmem>>, vector<1x64xf32>
    %107 = vector.broadcast %106 : vector<1x64xf32> to vector<16x64xf32>
    %108 = arith.addf %105, %107 : vector<16x64xf32>
    %109 = vector.shape_cast %108 : vector<16x64xf32> to vector<2x8x64xf32>
    %c0_38 = arith.constant 0 : index
    %c0_39 = arith.constant 0 : index
    %c0_40 = arith.constant 0 : index
    %110 = vector.load %arg6[%c0_38, %c0_39, %c0_40] : memref<2x8x64xf32, #tpu.memory_space<vmem>>, vector<2x8x64xf32>
    tpu.vector_store %arg6[%c0_38, %c0_39, %c0_40], %109 {strides = array<i32>} : memref<2x8x64xf32, #tpu.memory_space<vmem>>, vector<2x8x64xf32>,
    return
  }
  func.func @transform_0(%arg0: i32) -> (i32, i32, i32) {
    %c0_i32 = arith.constant 0 : i32
    %c0_i32_0 = arith.constant 0 : i32
    %c0_i32_1 = arith.constant 0 : i32
    return %arg0, %c0_i32, %c0_i32_0 : i32, i32, i32
  }
  func.func @transform_1(%arg0: i32) -> (i32, i32) {
    %c0_i32 = arith.constant 0 : i32
    %c0_i32_0 = arith.constant 0 : i32
    %c0_i32_1 = arith.constant 0 : i32
    return %c0_i32, %c0_i32_0 : i32, i32
  }
  func.func @transform_2(%arg0: i32) -> (i32, i32) {
    %c0_i32 = arith.constant 0 : i32
    %c0_i32_0 = arith.constant 0 : i32
    %c0_i32_1 = arith.constant 0 : i32
    return %c0_i32, %c0_i32_0 : i32, i32
  }
  func.func @transform_3(%arg0: i32) -> (i32, i32) {
    %c0_i32 = arith.constant 0 : i32
    %c0_i32_0 = arith.constant 0 : i32
    %c0_i32_1 = arith.constant 0 : i32
    return %c0_i32, %c0_i32_0 : i32, i32
  }
  func.func @transform_4(%arg0: i32) -> (i32, i32) {
    %c0_i32 = arith.constant 0 : i32
    %c0_i32_0 = arith.constant 0 : i32
    %c0_i32_1 = arith.constant 0 : i32
    return %c0_i32, %c0_i32_0 : i32, i32
  }
  func.func @transform_5(%arg0: i32) -> (i32, i32, i32) {
    %c0_i32 = arith.constant 0 : i32
    %c0_i32_0 = arith.constant 0 : i32
    %c0_i32_1 = arith.constant 0 : i32
    return %arg0, %c0_i32, %c0_i32_0 : i32, i32, i32
  }
}

</mosaic_0001>

<bundles_post_ra>
// kernel: tpu_custom_call.1
= control target key start
LH: loop header
LB: loop body
LE: loop exit
PB: predicated region body
PF: predicated region fallthrough
CT: control target
= control target key end

     0   :  { %10 = vsyncpa [#allocation4], 0  ;;  %s2211_s0 = inlined_call_operand.hbm [shape: f32[2,8,64], index: 0, kind: input, shape index: {}]   ;;  %s2212_s1 = inlined_call_operand.hbm [shape: f32[64,192], index: 1, kind: input, shape index: {}]   ;;  %s2213_s2 = inlined_call_operand.vmem [shape: f32[1,192], index: 2, kind: input, shape index: {}]   ;;  %s2214_s3 = inlined_call_operand.hbm [shape: f32[64,64], index: 3, kind: input, shape index: {}]   ;;  %s2215_s4 = inlined_call_operand.vmem [shape: f32[1,64], index: 4, kind: input, shape index: {}]   ;;  %s2216_s5 = inlined_call_operand.hbm [shape: f32[2,8,64], index: 5, kind: output, shape index: {}]  }
   0x1   :  { %11 = vsyncpa [#allocation7], 0 }
   0x2   :  { %12 = vsyncpa [#allocation5], 0  ;;  %s1973_s18 = smov [#allocation6]  }
   0x3   :  { %s30_s19 = sshll.u32 %s1973_s18, 4  ;;  %s31_s19 = int_to_ptr.vmem [resolvable:$true] %s30_s19 }
   0x4   :  { %s1895_s20 = scalar_lea.vmem %s31_s19, 2048  ;;  %p1900_p1 = scmp.lt.s32.totalorder %s31_s19, %s31_s19 }
   0x5   :  { %p1896_p0 = scmp.ne.s32.totalorder %s31_s19, %s1895_s20  ;;  %p1901_p2 = scmp.lt.s32.totalorder %s1895_s20, %s1895_s20 }
   0x7   :  { %p1902_p3 = por %p1901_p2, %p1900_p1 }
   0x9   :  { %p1903_p4 = pnand %p1902_p3, %p1896_p0 }
   0xb   :  { %1906 = shalt.err (!%p1903_p4)
}
   0xc   :  { %s1974_s21 = smov 256   ;;  %s1975_s22 = smov 16  }
   0xd   :  { %36 = dma.hbm_to_vmem [thread:$0]  %s2212_s1, 2048, %s31_s19, [#allocation7], %s1974_s21, %s1974_s21, %s1975_s22  }
   0xe   :  { %s1976_s25 = smov [#allocation3]  }
   0xf   :  { %s18_s26 = sshll.u32 %s1976_s25, 4  ;;  %s19_s26 = int_to_ptr.vmem [resolvable:$true] %s18_s26 }
  0x10   :  { %s1915_s27 = scalar_lea.vmem %s19_s26, 256  ;;  %p1920_p6 = scmp.lt.s32.totalorder %s19_s26, %s19_s26 }
  0x11   :  { %p1916_p5 = scmp.ne.s32.totalorder %s19_s26, %s1915_s27  ;;  %p1921_p7 = scmp.lt.s32.totalorder %s1915_s27, %s1915_s27 }
  0x13   :  { %p1922_p8 = por %p1921_p7, %p1920_p6 }
  0x15   :  { %p1923_p9 = pnand %p1922_p8, %p1916_p5 }
  0x17   :  { %1926 = shalt.err (!%p1923_p9)
}
  0x18   :  { %s1977_s28 = smov 128   ;;  %s1978_s29 = smov 8  }
  0x19   :  { %24 = dma.hbm_to_vmem [thread:$0]  %s2211_s0, 256, %s19_s26, [#allocation4], %s1977_s28, %s1977_s28, %s1978_s29  }
  0x1a   :  { %s1979_s1 = smov [#allocation8]  }
  0x1b   :  { %s44_s7 = sshll.u32 %s1979_s1, 4  ;;  %s45_s7 = int_to_ptr.vmem [resolvable:$true] %s44_s7 }
  0x1c   :  { %s1935_s8 = scalar_lea.vmem %s45_s7, 1024  ;;  %p1940_p11 = scmp.lt.s32.totalorder %s45_s7, %s45_s7 }
  0x1d   :  { %p1936_p10 = scmp.ne.s32.totalorder %s45_s7, %s1935_s8  ;;  %p1941_p12 = scmp.lt.s32.totalorder %s1935_s8, %s1935_s8 }
  0x1f   :  { %p1942_p13 = por %p1941_p12, %p1940_p11 }
  0x21   :  { %p1943_p0 = pnand %p1942_p13, %p1936_p10 }
  0x23   :  { %1946 = shalt.err (!%p1943_p0)
}
  0x24   :  { %50 = dma.hbm_to_vmem [thread:$0]  %s2214_s3, 1024, %s45_s7, [#allocation7], %s1977_s28, %s1977_s28, %s1978_s29  }
  0x25   :  { %1967 = dma.done.wait [#allocation4], 256  }
  0x26   :  { %1968 = vsyncadd [#allocation4], 4294967040 }
  0x27   :  { %1969 = dma.done.wait [#allocation7], 3072  }
  0x28   :  { %1970 = vsyncadd [#allocation7], 4294964224  ;;  %v1980_v0 = vmov 0.0   ;;  %v79_v1 = vld [vmem:[#allocation6 + $0x78] sm:$0xff]  ;;  %v78_v2 = vld [vmem:[#allocation6 + $0x70] sm:$0xff]  ;;  %vm92_vm0 = vcmask 523264   ;;  %v82_v19 = vlaneseq }
  0x29   :  { %163 = vmatprep.mubr.f32.mxu0 %v1980_v0  ;;  %1745 = vmatprep.subr.mxu1 %v1980_v0  ;;  %v77_v3 = vld [vmem:[#allocation6 + $0x68] sm:$0xff]  ;;  %v76_v4 = vld [vmem:[#allocation6 + $0x60] sm:$0xff]  ;;  %v75_v5 = vld [vmem:[#allocation6 + $0x58] sm:$0xff]  ;;  %vm1981_vm1 = vmmov 0   ;;  %s1982_s11 = smov 64   ;;  %vm179_vm2 = vcmask 130048  }
  0x2a   :  { %115 = vmatprep.subr.mxu0 %v79_v1  ;;  %v74_v6 = vld [vmem:[#allocation6 + $0x50] sm:$0xff]  ;;  %v73_v7 = vld [vmem:[#allocation6 + $0x48] sm:$0xff]  ;;  %v72_v8 = vld [vmem:[#allocation6 + $0x40] sm:$0xff]  ;;  %v83_v20 = vshrl.u32 %v82_v19, 7  ;;  %1747 = vmatprep.mubr.msk.f32.mxu1 %vm1981_vm1, %v1980_v0  ;;  %vm331_vm3 = vcmask 64512   ;;  %s1984_s12 = smov 112  }
  0x2b   :  { %116 = vmatpush1.msra.mxu0 %v78_v2  ;;  %v71_v9 = vld [vmem:[#allocation6 + $0x38] sm:$0xff]  ;;  %v70_v10 = vld [vmem:[#allocation6 + $0x30] sm:$0xff]  ;;  %v69_v11 = vld [vmem:[#allocation6 + $0x28] sm:$0xff]  ;;  %s1985_s13 = smov 32   ;;  %s1986_s14 = smov 96   ;;  %vm854_vm4 = vcmask 261248  }
  0x2c   :  { %117 = vmatprep.subr.mxu0 %v77_v3  ;;  %v68_v12 = vld [vmem:[#allocation6 + $0x20] sm:$0xff]  ;;  %v67_v13 = vld [vmem:[#allocation6 + $0x18] sm:$0xff]  ;;  %v66_v14 = vld [vmem:[#allocation6 + $0x10] sm:$0xff]  ;;  %v84_v21 = vsub.s32 0, %v83_v20  ;;  %v88_v29 = vsub.s32 1, %v83_v20  ;;  %s1987_s15 = smov 80  }
  0x2d   :  { %118 = vmatpush1.msra.mxu0 %v76_v4  ;;  %v65_v15 = vld [vmem:[#allocation6 + $0x8] sm:$0xff]  ;;  %v64_v16 = vld [vmem:[#allocation6] sm:$0xff]  ;;  %v62_v17 = vld [vmem:[#allocation3] sm:$0xff]  ;;  %vm1201_vm5 = vcmask 392448   ;;  %vm1548_vm6 = vcmask 523648   ;;  %s1988_s18 = smov [#allocation9]  }
  0x2e   :  { %119 = vmatprep.subr.mxu0 %v75_v5  ;;  %v63_v18 = vld [vmem:[#allocation3 + $0x8] sm:$0xff]  ;;  %v80_v22 = vld [vmem:[%s2213_s2] sm:$0x3]  ;;  %s1983_s2 = smov 48   ;;  %s1656_s19 = sshll.u32 %s1988_s18, 4  ;;  %s1657_s19 = int_to_ptr.vmem [resolvable:$true] %s1656_s19 }
  0x2f   :  { %120 = vmatpush1.msra.mxu0 %v74_v6  ;;  %v85_v23 = vrot.slane %v80_v22, %v84_v21  ;;  %v89_v31 = vrot.slane %v80_v22, %v88_v29  ;;  %s1947_s20 = scalar_lea.vmem %s1657_s19, 256  ;;  %p1952_p2 = scmp.lt.s32.totalorder %s1657_s19, %s1657_s19 }
  0x30   :  { %121 = vmatprep.subr.mxu0 %v73_v7  ;;  %p1948_p1 = scmp.ne.s32.totalorder %s1657_s19, %s1947_s20  ;;  %p1953_p3 = scmp.lt.s32.totalorder %s1947_s20, %s1947_s20 }
  0x31   :  { %122 = vmatpush1.msra.mxu0 %v72_v8 }
  0x32   :  { %123 = vmatprep.subr.mxu0 %v71_v9  ;;  %p1954_p4 = por %p1953_p3, %p1952_p2 }
  0x33   :  { %124 = vmatpush1.msra.mxu0 %v70_v10 }
  0x34   :  { %125 = vmatprep.subr.mxu0 %v69_v11  ;;  %p1955_p5 = pnand %p1954_p4, %p1948_p1 }
  0x35   :  { %126 = vmatpush1.msra.mxu0 %v68_v12 }
  0x36   :  { %127 = vmatprep.subr.mxu0 %v67_v13 }
  0x37   :  { %128 = vmatpush1.msra.mxu0 %v66_v14 }
  0x38   :  { %129 = vmatprep.subr.mxu0 %v65_v15 }
  0x39   :  { %130 = vmatpush1.msra.mxu0 %v64_v16 }
  0x3a   :  { %1669 = vmatmul.mubr.msk.f32.vlgmr.msra.gmra.mxu0 %vm92_vm0, %v62_v17  ;;  %1740 = vmatprep.subr.mxu0 %v1980_v0 }
  0x3b   :  { %169 = vmatprep.mubr.f32.mxu0 %v1980_v0 }
  0x3e   :  { %1670 = vmatmul.mubr.msk.f32.gmra.mxu0 %vm92_vm0, %v63_v18 }
  0x3f   :  { %1742 = vmatprep.mubr.msk.f32.mxu0 %vm1981_vm1, %v1980_v0 }
  0xfa   :  { %v165_v24 = vpop.f32.mrf.mxu0 }
  0xfb   :  { %v2048_v25 = vadd.f32 %v165_v24, %v85_v23 }
  0xfc   :  { %v167_v26 = vpop.f32.mrf.mxu0 }
  0xfd   :  { %177 = vrot.lane.b32.xlu0 %v2048_v25, %s1982_s11  ;;  %v2062_v33 = vadd.f32 %v167_v26, %v89_v31 }
  0xfe   :  { %v171_v27 = vpop.f32.mrf.mxu0 }
  0xff   :  { %v2051_v28 = vadd.f32 %v171_v27, %v85_v23 }
 0x100   :  { %v173_v34 = vpop.f32.mrf.mxu0 }
 0x101   :  { %255 = vrot.lane.b32.xlu0 %v2051_v28, %s1982_s11  ;;  %v2087_v2 = vadd.f32 %v173_v34, %v89_v31 }
 0x16f   :  { %v178_v30 = vpop.permute.xlu0 %177 }
 0x170   :  { %1741 = vmatpush3.xpose.msk.msra.mxu0 %vm179_vm2, %v178_v30 }
 0x171   :  { %1765 = vmatprep.subr.mxu0 %v1980_v0 }
 0x173   :  { %1743 = vmatmul.mubr.msk.f32.vlgmr.msra.gmra.mxu0 %vm179_vm2, %v2048_v25  ;;  %v256_v32 = vpop.permute.xlu0 %255 }
 0x174   :  { %1746 = vmatpush3.xpose.msk.msra.mxu1 %vm179_vm2, %v256_v32  ;;  %1767 = vmatprep.mubr.msk.f32.mxu0 %vm1981_vm1, %v1980_v0 }
 0x175   :  { %1750 = vmatprep.subr.mxu1 %v1980_v0 }
 0x177   :  { %1748 = vmatmul.mubr.msk.f32.vlgmr.msra.gmra.mxu1 %vm179_vm2, %v2051_v28 }
 0x178   :  { %1751 = vmatpush3.msra.mxu1 %v2062_v33  ;;  %1752 = vmatprep.mubr.msk.f32.mxu1 %vm1981_vm1, %v1980_v0 }
 0x179   :  { %1755 = vmatprep.subr.mxu1 %v1980_v0 }
 0x233   :  { %v250_v35 = vpop.f32.mrf.mxu0 }
 0x234   :  { %v332_v36 = vsel %vm331_vm3, %v250_v35, -inf }
 0x235   :  { %333 = vmax.xlane.f32.xlu1 %v332_v36  ;;  %v1744_v37 = vpop.f32.mrf.mxu0 }
 0x237   :  { %v327_v38 = vpop.f32.mrf.mxu1 }
 0x238   :  { %v335_v39 = vsel %vm331_vm3, %v327_v38, -inf }
 0x239   :  { %336 = vmax.xlane.f32.xlu1 %v335_v39  ;;  %v1749_v40 = vpop.f32.mrf.mxu1 }
 0x24a   :  { %510 = vrot.lane.b32.xlu1 %v2048_v25, %s1983_s2 }
 0x24e   :  { %588 = vrot.lane.b32.xlu1 %v2051_v28, %s1983_s2 }
 0x2be   :  { %v334_v41 = vpop.xlane.xlu1 %333 }
 0x2bf   :  { %v338_v42 = vsub.f32 %v250_v35, %v334_v41 }
 0x2c1   :  { %v340_v43 = vmul.f32 1.442695, %v338_v42 }
 0x2c2   :  { %v337_v44 = vpop.xlane.xlu1 %336 }
 0x2c3   :  { %1855 = vpow2.f32 %v340_v43  ;;  %v339_v45 = vsub.f32 %v327_v38, %v337_v44 }
 0x2c5   :  { %v342_v46 = vmul.f32 1.442695, %v339_v45 }
 0x2c6   :  { %v511_v47 = vpop.permute.xlu1 %510 }
 0x2c7   :  { %1857 = vpow2.f32 %v342_v46 }
 0x2ca   :  { %v589_v48 = vpop.permute.xlu1 %588 }
 0x2cb   :  { %1766 = vmatpush3.xpose.msk.msra.mxu0 %vm179_vm2, %v589_v48 }
 0x2cc   :  { %1775 = vmatprep.subr.mxu0 %v1980_v0 }
 0x2d0   :  { %v1856_v49 = vpop.eup %1855 }
 0x2d1   :  { %v344_v50 = vsel %vm331_vm3, %v1856_v49, 0.0 }
 0x2d2   :  { %345 = vadd.xlane.f32.xlu0 %v344_v50 }
 0x2d4   :  { %v1858_v51 = vpop.eup %1857 }
 0x2d5   :  { %v347_v52 = vsel %vm331_vm3, %v1858_v51, 0.0 }
 0x2d6   :  { %348 = vadd.xlane.f32.xlu1 %v347_v52 }
 0x2e7   :  { %508 = vrot.lane.b32.xlu1 %v2048_v25, %s1984_s12 }
 0x2eb   :  { %586 = vrot.lane.b32.xlu1 %v2051_v28, %s1984_s12 }
 0x35b   :  { %v346_v53 = vpop.xlane.xlu0 %345 }
 0x35c   :  { %1859 = vrcp.f32 %v346_v53 }
 0x35f   :  { %v349_v54 = vpop.xlane.xlu1 %348 }
 0x360   :  { %1861 = vrcp.f32 %v349_v54 }
 0x363   :  { %v509_v55 = vpop.permute.xlu1 %508 }
 0x367   :  { %v587_v56 = vpop.permute.xlu1 %586 }
 0x368   :  { %1768 = vmatmul.mubr.msk.f32.vlgmr.msra.gmra.mxu0 %vm179_vm2, %v587_v56 }
 0x369   :  { %v1860_v57 = vpop.eup %1859  ;;  %1777 = vmatprep.mubr.msk.f32.mxu0 %vm1981_vm1, %v1980_v0 }
 0x36a   :  { %v352_v58 = vmul.f32 %v1860_v57, %v346_v53 }
 0x36c   :  { %v354_v59 = vsub.f32 2.0, %v352_v58 }
 0x36d   :  { %v1862_v60 = vpop.eup %1861 }
 0x36e   :  { %v356_v61 = vmul.f32 %v1860_v57, %v354_v59  ;;  %v353_v62 = vmul.f32 %v1862_v60, %v349_v54 }
 0x370   :  { %v358_v63 = vmul.f32 %v1856_v49, %v356_v61  ;;  %v355_v1 = vsub.f32 2.0, %v353_v62 }
 0x372   :  { %v357_v3 = vmul.f32 %v1862_v60, %v355_v1  ;;  %1753 = vmatmul.mubr.msk.f32.vlgmr.msra.gmra.mxu1 %vm331_vm3, %v358_v63 }
 0x373   :  { %1756 = vmatpush3.msra.mxu1 %v2087_v2  ;;  %1757 = vmatprep.mubr.msk.f32.mxu1 %vm1981_vm1, %v1980_v0 }
 0x374   :  { %v359_v4 = vmul.f32 %v1858_v51, %v357_v3  ;;  %1760 = vmatprep.subr.mxu1 %v1980_v0 }
 0x376   :  { %1758 = vmatmul.mubr.msk.f32.vlgmr.msra.gmra.mxu1 %vm331_vm3, %v359_v4 }
 0x377   :  { %1761 = vmatpush3.xpose.msk.msra.mxu1 %vm179_vm2, %v511_v47  ;;  %1762 = vmatprep.mubr.msk.f32.mxu1 %vm1981_vm1, %v1980_v0 }
 0x378   :  { %1770 = vmatprep.subr.mxu1 %v1980_v0 }
 0x37a   :  { %1763 = vmatmul.mubr.msk.f32.vlgmr.msra.gmra.mxu1 %vm179_vm2, %v509_v55 }
 0x37b   :  { %1772 = vmatprep.mubr.msk.f32.mxu1 %vm1981_vm1, %v1980_v0 }
 0x428   :  { %v660_v5 = vpop.f32.mrf.mxu0 }
 0x429   :  { %v667_v6 = vsel %vm331_vm3, %v660_v5, -inf }
 0x42a   :  { %668 = vmax.xlane.f32.xlu1 %v667_v6  ;;  %v1769_v7 = vpop.f32.mrf.mxu0 }
 0x432   :  { %v429_v8 = vpop.f32.mrf.mxu1 }
 0x433   :  { %506 = vst.msk [vmem:[#allocation2] sm:$0xff] %vm179_vm2, %v429_v8 }
 0x434   :  { %v1754_v9 = vpop.f32.mrf.mxu1 }
 0x436   :  { %v502_v10 = vpop.f32.mrf.mxu1 }
 0x437   :  { %507 = vst.msk [vmem:[#allocation2 + $0x8] sm:$0xff] %vm179_vm2, %v502_v10 }
 0x438   :  { %v1759_v11 = vpop.f32.mrf.mxu1 }
 0x43a   :  { %v582_v12 = vpop.f32.mrf.mxu1 }
 0x43b   :  { %937 = vrot.lane.b32.xlu1 %v2051_v28, %s1985_s13  ;;  %v664_v13 = vsel %vm331_vm3, %v582_v12, -inf }
 0x43c   :  { %665 = vmax.xlane.f32.xlu0 %v664_v13  ;;  %v1764_v14 = vpop.f32.mrf.mxu1 }
 0x4b3   :  { %v669_v15 = vpop.xlane.xlu1 %668 }
 0x4b4   :  { %v671_v16 = vsub.f32 %v660_v5, %v669_v15 }
 0x4b6   :  { %v674_v17 = vmul.f32 1.442695, %v671_v16 }
 0x4b7   :  { %v938_v36 = vpop.permute.xlu1 %937 }
 0x4b8   :  { %1863 = vpow2.f32 %v674_v17 }
 0x4c5   :  { %v1864_v18 = vpop.eup %1863  ;;  %v666_v20 = vpop.xlane.xlu0 %665 }
 0x4c6   :  { %v679_v19 = vsel %vm331_vm3, %v1864_v18, 0.0  ;;  %v670_v21 = vsub.f32 %v582_v12, %v666_v20 }
 0x4c7   :  { %680 = vadd.xlane.f32.xlu0 %v679_v19 }
 0x4c8   :  { %v672_v22 = vmul.f32 1.442695, %v670_v21 }
 0x4ca   :  { %1865 = vpow2.f32 %v672_v22 }
 0x4d7   :  { %v1866_v23 = vpop.eup %1865 }
 0x4d8   :  { %v676_v24 = vsel %vm331_vm3, %v1866_v23, 0.0 }
 0x4dd   :  { %693 = vrot.lane.b32.xlu0 %v2062_v33, %s1984_s12 }
 0x4e1   :  { %770 = vrot.lane.b32.xlu0 %v2087_v2, %s1984_s12 }
 0x500   :  { %677 = vadd.xlane.f32.xlu0 %v676_v24 }
 0x516   :  { %859 = vrot.lane.b32.xlu0 %v2048_v25, %s1985_s13 }
 0x51a   :  { %857 = vrot.lane.b32.xlu0 %v2048_v25, %s1986_s14 }
 0x51e   :  { %935 = vrot.lane.b32.xlu0 %v2051_v28, %s1986_s14 }
 0x550   :  { %v681_v26 = vpop.xlane.xlu0 %680 }
 0x551   :  { %1867 = vrcp.f32 %v681_v26 }
 0x554   :  { %v694_v27 = vpop.permute.xlu0 %693 }
 0x555   :  { %1771 = vmatpush3.msra.mxu1 %v694_v27 }
 0x556   :  { %1780 = vmatprep.subr.mxu1 %v1980_v0 }
 0x558   :  { %v771_v29 = vpop.permute.xlu0 %770 }
 0x559   :  { %1776 = vmatpush3.msra.mxu0 %v771_v29 }
 0x55a   :  { %1785 = vmatprep.subr.mxu0 %v1980_v0 }
 0x55e   :  { %v1868_v30 = vpop.eup %1867 }
 0x55f   :  { %v685_v31 = vmul.f32 %v1868_v30, %v681_v26 }
 0x561   :  { %v687_v32 = vsub.f32 2.0, %v685_v31 }
 0x563   :  { %v689_v34 = vmul.f32 %v1868_v30, %v687_v32 }
 0x565   :  { %v691_v35 = vmul.f32 %v1864_v18, %v689_v34 }
 0x567   :  { %1778 = vmatmul.mubr.msk.f32.vlgmr.msra.gmra.mxu0 %vm331_vm3, %v691_v35 }
 0x568   :  { %1786 = vmatpush3.xpose.msk.msra.mxu0 %vm179_vm2, %v938_v36  ;;  %1787 = vmatprep.mubr.msk.f32.mxu0 %vm1981_vm1, %v1980_v0 }
 0x569   :  { %1795 = vmatprep.subr.mxu0 %v1980_v0 }
 0x589   :  { %v678_v37 = vpop.xlane.xlu0 %677 }
 0x58a   :  { %1869 = vrcp.f32 %v678_v37 }
 0x58d   :  { %v860_v38 = vpop.permute.xlu0 %859 }
 0x591   :  { %v858_v39 = vpop.permute.xlu0 %857 }
 0x595   :  { %v936_v40 = vpop.permute.xlu0 %935 }
 0x596   :  { %1788 = vmatmul.mubr.msk.f32.vlgmr.msra.gmra.mxu0 %vm179_vm2, %v936_v40 }
 0x597   :  { %v1870_v41 = vpop.eup %1869  ;;  %1797 = vmatprep.mubr.msk.f32.mxu0 %vm1981_vm1, %v1980_v0 }
 0x598   :  { %v684_v42 = vmul.f32 %v1870_v41, %v678_v37 }
 0x59a   :  { %v686_v43 = vsub.f32 2.0, %v684_v42 }
 0x59c   :  { %v688_v44 = vmul.f32 %v1870_v41, %v686_v43 }
 0x59e   :  { %v690_v45 = vmul.f32 %v1866_v23, %v688_v44 }
 0x5a0   :  { %1773 = vmatmul.mubr.msk.f32.vlgmr.msra.gmra.mxu1 %vm331_vm3, %v690_v45 }
 0x5a1   :  { %1781 = vmatpush3.xpose.msk.msra.mxu1 %vm179_vm2, %v860_v38  ;;  %1782 = vmatprep.mubr.msk.f32.mxu1 %vm1981_vm1, %v1980_v0 }
 0x5a2   :  { %1790 = vmatprep.subr.mxu1 %v1980_v0 }
 0x5a4   :  { %1783 = vmatmul.mubr.msk.f32.vlgmr.msra.gmra.mxu1 %vm179_vm2, %v858_v39 }
 0x5a5   :  { %1792 = vmatprep.mubr.msk.f32.mxu1 %vm1981_vm1, %v1980_v0 }
 0x627   :  { %v2138_v46 = vpop.f32.mrf.mxu0 }
 0x629   :  { %v1779_v47 = vpop.f32.mrf.mxu0 }
 0x656   :  { %v1009_v48 = vpop.f32.mrf.mxu0 }
 0x657   :  { %v1016_v49 = vsel %vm331_vm3, %v1009_v48, -inf }
 0x658   :  { %1017 = vmax.xlane.f32.xlu1 %v1016_v49  ;;  %v1789_v50 = vpop.f32.mrf.mxu0 }
 0x660   :  { %v2141_v51 = vpop.f32.mrf.mxu1 }
 0x662   :  { %v1774_v52 = vpop.f32.mrf.mxu1 }
 0x664   :  { %v931_v53 = vpop.f32.mrf.mxu1 }
 0x665   :  { %v1013_v54 = vsel %vm331_vm3, %v931_v53, -inf }
 0x666   :  { %1014 = vmax.xlane.f32.xlu0 %v1013_v54  ;;  %v1784_v55 = vpop.f32.mrf.mxu1 }
 0x669   :  { %1117 = vrot.lane.b32.xlu1 %v2087_v2, %s1986_s14 }
 0x66d   :  { %1206 = vrot.lane.b32.xlu1 %v2048_v25, %s1975_s22 }
 0x671   :  { %1204 = vrot.lane.b32.xlu1 %v2048_v25, %s1987_s15 }
 0x6e1   :  { %v1018_v56 = vpop.xlane.xlu1 %1017 }
 0x6e2   :  { %v1020_v57 = vsub.f32 %v1009_v48, %v1018_v56 }
 0x6e4   :  { %v1023_v58 = vmul.f32 1.442695, %v1020_v57 }
 0x6e5   :  { %v1118_v59 = vpop.permute.xlu1 %1117 }
 0x6e6   :  { %1871 = vpow2.f32 %v1023_v58  ;;  %1796 = vmatpush3.msra.mxu0 %v1118_v59  ;;  %v1560_v58 = vld [vmem:[#allocation8 + $0x38] sm:$0xff]  ;;  %v1559_v59 = vld [vmem:[#allocation8 + $0x30] sm:$0xff] }
 0x6e7   :  { %1805 = vmatprep.subr.mxu0 %v1980_v0 }
 0x6e9   :  { %v1207_v17 = vpop.permute.xlu1 %1206 }
 0x6ed   :  { %v1205_v19 = vpop.permute.xlu1 %1204 }
 0x6ef   :  { %v1015_v60 = vpop.xlane.xlu0 %1014 }
 0x6f0   :  { %v1019_v61 = vsub.f32 %v931_v53, %v1015_v60  ;;  %v1558_v60 = vld [vmem:[#allocation8 + $0x28] sm:$0xff] }
 0x6f2   :  { %v1021_v62 = vmul.f32 1.442695, %v1019_v61  ;;  %v1557_v61 = vld [vmem:[#allocation8 + $0x20] sm:$0xff] }
 0x6f3   :  { %v1872_v63 = vpop.eup %1871 }
 0x6f4   :  { %1873 = vpow2.f32 %v1021_v62  ;;  %v1028_v1 = vsel %vm331_vm3, %v1872_v63, 0.0 }
 0x6f5   :  { %1029 = vadd.xlane.f32.xlu0 %v1028_v1  ;;  %v1556_v1 = vld [vmem:[#allocation8 + $0x18] sm:$0xff] }
 0x701   :  { %v1874_v3 = vpop.eup %1873 }
 0x702   :  { %v1025_v4 = vsel %vm331_vm3, %v1874_v3, 0.0 }
 0x703   :  { %1026 = vadd.xlane.f32.xlu0 %v1025_v4  ;;  %v1554_v4 = vld [vmem:[#allocation8 + $0x8] sm:$0xff] }
 0x719   :  { %1041 = vrot.lane.b32.xlu0 %v2062_v33, %s1986_s14 }
 0x71d   :  { %1284 = vrot.lane.b32.xlu0 %v2051_v28, %s1975_s22 }
 0x721   :  { %1282 = vrot.lane.b32.xlu0 %v2051_v28, %s1987_s15 }
 0x77e   :  { %v1030_v25 = vpop.xlane.xlu0 %1029 }
 0x77f   :  { %1875 = vrcp.f32 %v1030_v25 }
 0x78c   :  { %v1876_v5 = vpop.eup %1875  ;;  %v1027_v6 = vpop.xlane.xlu0 %1026 }
 0x78d   :  { %v1034_v7 = vmul.f32 %v1876_v5, %v1030_v25  ;;  %1877 = vrcp.f32 %v1027_v6  ;;  %v1553_v25 = vld [vmem:[#allocation8] sm:$0xff] }
 0x78f   :  { %v1036_v8 = vsub.f32 2.0, %v1034_v7 }
 0x790   :  { %v1042_v9 = vpop.permute.xlu0 %1041 }
 0x791   :  { %v1038_v10 = vmul.f32 %v1876_v5, %v1036_v8  ;;  %1791 = vmatpush3.msra.mxu1 %v1042_v9 }
 0x792   :  { %1800 = vmatprep.subr.mxu1 %v1980_v0 }
 0x793   :  { %v1040_v11 = vmul.f32 %v1872_v63, %v1038_v10 }
 0x794   :  { %v1285_v12 = vpop.permute.xlu0 %1284 }
 0x795   :  { %1798 = vmatmul.mubr.msk.f32.vlgmr.msra.gmra.mxu0 %vm331_vm3, %v1040_v11  ;;  %v1695_v11 = vld [vmem:[%s2215_s4] ss:$0 sm:$0xff] }
 0x796   :  { %1806 = vmatpush3.xpose.msk.msra.mxu0 %vm179_vm2, %v1285_v12  ;;  %1807 = vmatprep.mubr.msk.f32.mxu0 %vm1981_vm1, %v1980_v0 }
 0x797   :  { %1815 = vmatprep.subr.mxu0 %v1980_v0 }
 0x798   :  { %v1283_v28 = vpop.permute.xlu0 %1282 }
 0x799   :  { %1808 = vmatmul.mubr.msk.f32.vlgmr.msra.gmra.mxu0 %vm179_vm2, %v1283_v28 }
 0x79a   :  { %v1878_v13 = vpop.eup %1877  ;;  %1817 = vmatprep.mubr.msk.f32.mxu0 %vm1981_vm1, %v1980_v0 }
 0x79b   :  { %v1033_v14 = vmul.f32 %v1878_v13, %v1027_v6 }
 0x79d   :  { %v1035_v15 = vsub.f32 2.0, %v1033_v14 }
 0x79f   :  { %v1037_v16 = vmul.f32 %v1878_v13, %v1035_v15 }
 0x7a1   :  { %v1039_v18 = vmul.f32 %v1874_v3, %v1037_v16  ;;  %v1555_v3 = vld [vmem:[#allocation8 + $0x10] sm:$0xff] }
 0x7a3   :  { %1793 = vmatmul.mubr.msk.f32.vlgmr.msra.gmra.mxu1 %vm331_vm3, %v1039_v18 }
 0x7a4   :  { %1801 = vmatpush3.xpose.msk.msra.mxu1 %vm179_vm2, %v1207_v17  ;;  %1802 = vmatprep.mubr.msk.f32.mxu1 %vm1981_vm1, %v1980_v0 }
 0x7a5   :  { %1810 = vmatprep.subr.mxu1 %v1980_v0 }
 0x7a7   :  { %1803 = vmatmul.mubr.msk.f32.vlgmr.msra.gmra.mxu1 %vm179_vm2, %v1205_v19 }
 0x7a8   :  { %1812 = vmatprep.mubr.msk.f32.mxu1 %vm1981_vm1, %v1980_v0 }
 0x855   :  { %v1189_v20 = vpop.f32.mrf.mxu0 }
 0x857   :  { %v1799_v21 = vpop.f32.mrf.mxu0 }
 0x859   :  { %v1356_v22 = vpop.f32.mrf.mxu0 }
 0x85a   :  { %v1363_v23 = vsel %vm331_vm3, %v1356_v22, -inf }
 0x85b   :  { %1364 = vmax.xlane.f32.xlu0 %v1363_v23  ;;  %v1809_v24 = vpop.f32.mrf.mxu0 }
 0x863   :  { %v1113_v26 = vpop.f32.mrf.mxu1 }
 0x865   :  { %v1794_v27 = vpop.f32.mrf.mxu1 }
 0x867   :  { %v1278_v29 = vpop.f32.mrf.mxu1 }
 0x868   :  { %v1360_v30 = vsel %vm331_vm3, %v1278_v29, -inf }
 0x869   :  { %1361 = vmax.xlane.f32.xlu1 %v1360_v30  ;;  %v1804_v31 = vpop.f32.mrf.mxu1 }
 0x8e4   :  { %v1365_v32 = vpop.xlane.xlu0 %1364 }
 0x8e5   :  { %v1367_v34 = vsub.f32 %v1356_v22, %v1365_v32 }
 0x8e7   :  { %v1370_v35 = vmul.f32 1.442695, %v1367_v34 }
 0x8e9   :  { %1879 = vpow2.f32 %v1370_v35 }
 0x8f2   :  { %v1362_v36 = vpop.xlane.xlu1 %1361 }
 0x8f3   :  { %v1366_v0 = vsub.f32 %v1278_v29, %v1362_v36 }
 0x8f5   :  { %v1368_v37 = vmul.f32 1.442695, %v1366_v0 }
 0x8f6   :  { %v1880_v38 = vpop.eup %1879 }
 0x8f7   :  { %1881 = vpow2.f32 %v1368_v37  ;;  %v1375_v39 = vsel %vm331_vm3, %v1880_v38, 0.0 }
 0x8f8   :  { %1376 = vadd.xlane.f32.xlu1 %v1375_v39 }
 0x904   :  { %v1882_v40 = vpop.eup %1881 }
 0x905   :  { %v1372_v41 = vsel %vm331_vm3, %v1882_v40, 0.0 }
 0x906   :  { %1373 = vadd.xlane.f32.xlu0 %v1372_v41 }
 0x909   :  { %1464 = vrot.lane.b32.xlu1 %v2087_v2, %s1987_s15 }
 0x90d   :  { %848 = vrot.lane.b32.xlu1 %v2141_v51, %s1975_s22 }
 0x911   :  { %1195 = vrot.lane.b32.xlu1 %v1113_v26, %s1985_s13 }
 0x91c   :  { %1388 = vrot.lane.b32.xlu0 %v2062_v33, %s1987_s15 }
 0x920   :  { %850 = vrot.lane.b32.xlu0 %v2138_v46, %s1975_s22 }
 0x924   :  { %1197 = vrot.lane.b32.xlu0 %v1189_v20, %s1985_s13 }
 0x981   :  { %v1377_v42 = vpop.xlane.xlu1 %1376 }
 0x982   :  { %1883 = vrcp.f32 %v1377_v42 }
 0x985   :  { %v1465_v43 = vpop.permute.xlu1 %1464 }
 0x986   :  { %1816 = vmatpush3.msra.mxu0 %v1465_v43 }
 0x989   :  { %v849_v44 = vpop.permute.xlu1 %848 }
 0x98a   :  { %855 = vst.msk [vmem:[#allocation2] sm:$0xff] %vm854_vm4, %v849_v44 }
 0x98d   :  { %v1196_v2 = vpop.permute.xlu1 %1195 }
 0x98e   :  { %1202 = vst.msk [vmem:[#allocation2] sm:$0xff] %vm1201_vm5, %v1196_v2 }
 0x98f   :  { %v1884_v45 = vpop.eup %1883  ;;  %v1374_v47 = vpop.xlane.xlu0 %1373 }
 0x990   :  { %v1381_v33 = vmul.f32 %v1884_v45, %v1377_v42  ;;  %1885 = vrcp.f32 %v1374_v47 }
 0x992   :  { %v1383_v48 = vsub.f32 2.0, %v1381_v33 }
 0x993   :  { %v1389_v46 = vpop.permute.xlu0 %1388 }
 0x994   :  { %v1385_v49 = vmul.f32 %v1884_v45, %v1383_v48  ;;  %1811 = vmatpush3.msra.mxu1 %v1389_v46 }
 0x995   :  { %1820 = vmatprep.subr.mxu1 %v1560_v58 }
 0x996   :  { %v1387_v50 = vmul.f32 %v1880_v38, %v1385_v49 }
 0x997   :  { %v851_v51 = vpop.permute.xlu0 %850 }
 0x998   :  { %856 = vst.msk [vmem:[#allocation2 + $0x8] sm:$0xff] %vm854_vm4, %v851_v51  ;;  %1818 = vmatmul.mubr.msk.f32.vlgmr.msra.gmra.mxu0 %vm331_vm3, %v1387_v50 }
 0x99b   :  { %v1198_v52 = vpop.permute.xlu0 %1197 }
 0x99c   :  { %1203 = vst.msk [vmem:[#allocation2 + $0x8] sm:$0xff] %vm1201_vm5, %v1198_v52 }
 0x99d   :  { %v1886_v53 = vpop.eup %1885 }
 0x99e   :  { %v1380_v54 = vmul.f32 %v1886_v53, %v1374_v47 }
 0x9a0   :  { %v1382_v55 = vsub.f32 2.0, %v1380_v54 }
 0x9a2   :  { %v1384_v56 = vmul.f32 %v1886_v53, %v1382_v55 }
 0x9a4   :  { %v1386_v57 = vmul.f32 %v1882_v40, %v1384_v56 }
 0x9a6   :  { %1813 = vmatmul.mubr.msk.f32.vlgmr.msra.gmra.mxu1 %vm331_vm3, %v1386_v57 }
 0x9a7   :  { %1821 = vmatpush3.msra.mxu1 %v1560_v58 }
 0x9a8   :  { %1822 = vmatprep.subr.mxu1 %v1559_v59 }
 0x9a9   :  { %1823 = vmatpush3.msra.mxu1 %v1559_v59 }
 0x9aa   :  { %1824 = vmatprep.subr.mxu1 %v1558_v60 }
 0x9ab   :  { %1825 = vmatpush3.msra.mxu1 %v1558_v60 }
 0x9ac   :  { %1826 = vmatprep.subr.mxu1 %v1557_v61 }
 0x9ad   :  { %1827 = vmatpush3.msra.mxu1 %v1557_v61 }
 0x9ae   :  { %1828 = vmatprep.subr.mxu1 %v1556_v1 }
 0x9af   :  { %1829 = vmatpush3.msra.mxu1 %v1556_v1 }
 0x9b0   :  { %1830 = vmatprep.subr.mxu1 %v1555_v3 }
 0x9b1   :  { %1831 = vmatpush3.msra.mxu1 %v1555_v3 }
 0x9b2   :  { %1832 = vmatprep.subr.mxu1 %v1554_v4 }
 0x9b3   :  { %1833 = vmatpush3.msra.mxu1 %v1554_v4 }
 0x9b4   :  { %1834 = vmatprep.subr.mxu1 %v1553_v25 }
 0x9b5   :  { %1835 = vmatpush3.msra.mxu1 %v1553_v25 }
 0xa58   :  { %v1536_v62 = vpop.f32.mrf.mxu0 }
 0xa59   :  { %1544 = vrot.lane.b32.xlu0 %v1536_v62, %s1983_s2 }
 0xa5a   :  { %v1819_v63 = vpop.f32.mrf.mxu0 }
 0xa66   :  { %v1460_v5 = vpop.f32.mrf.mxu1 }
 0xa67   :  { %1542 = vrot.lane.b32.xlu1 %v1460_v5, %s1983_s2 }
 0xa68   :  { %v1814_v6 = vpop.f32.mrf.mxu1 }
 0xacb   :  { %v1545_v7 = vpop.permute.xlu0 %1544 }
 0xacc   :  { %1550 = vst.msk [vmem:[#allocation2 + $0x8] sm:$0xff] %vm1548_vm6, %v1545_v7 }
 0xad3   :  { %v1552_v10 = vld [vmem:[#allocation2 + $0x8] sm:$0xff] }
 0xad9   :  { %v1543_v8 = vpop.permute.xlu1 %1542 }
 0xada   :  { %1549 = vst.msk [vmem:[#allocation2] sm:$0xff] %vm1548_vm6, %v1543_v8 }
 0xae1   :  { %v1551_v9 = vld [vmem:[#allocation2] sm:$0xff] }
 0xae2   :  { %1836 = vmatprep.mubr.msk.f32.mxu1 %vm92_vm0, %v1551_v9 }
 0xae3   :  { %1837 = vmatmul.mubr.msk.f32.vlgmr.msra.gmra.mxu1 %vm92_vm0, %v1552_v10 }
 0xba3   :  { %v1838_v12 = vpop.f32.mrf.mxu1 }
 0xba4   :  { %v1646_v28 = vadd.f32 %v1838_v12, %v1695_v11 }
 0xba5   :  { %v1640_v13 = vpop.f32.mrf.mxu1 }
 0xba6   :  { %1650 = vst.msk [vmem:[#allocation9 + $0x8] sm:$0xff] %vm92_vm0, %v1646_v28  ;;  %v1641_v14 = vadd.f32 %v1695_v11, %v1640_v13 }
 0xba8   :  { %1649 = vst.msk [vmem:[#allocation9] sm:$0xff] %vm92_vm0, %v1641_v14 }
 0xba9   :  { %1958 = shalt.err (!%p1955_p5)
}
 0xbaa   :  { %1662 = dma.vmem_to_hbm [thread:$0]  %s1657_s19, 256, %s2216_s5, [#allocation5], %s1977_s28, %s1977_s28, %s1978_s29  }
 0xbab   :  { %1971 = dma.done.wait [#allocation5], 256  }
 0xbac   :  { %1972 = vsyncadd [#allocation5], 4294967040 }
 0xbad   :  { %1666 = vsyncpa [#allocation4], 1 }
 0xbae   :  { %1667 = vsyncpa [#allocation7], 1 }
 0xbaf   :  { %1668 = vsyncpa [#allocation5], 1 }

</bundles_post_ra>
